<compile_context>
chip_gen: v7x
topology: tpu7x:2x2x1
jax: 0.10.0
libtpu: 0.0.40
codegen_flags: <defaults>
</compile_context>

<pallas_src>
import jax
import jax.numpy as jnp
from jax.experimental import pallas as pl
from jax.experimental.pallas import tpu as pltpu

_LANE = 128


# ----------------------------------------------------------------------------
# Device-generation tuning (review items: v7x/v6e bigger tiles, v5e headroom).
# ----------------------------------------------------------------------------
def _device_kind() -> str:
    try:
        return jax.devices()[0].device_kind.lower()
    except Exception:  # pragma: no cover - defensive
        return ""


_KIND = _device_kind()
_IS_V7 = "v7" in _KIND
if _IS_V7:
    # 3 streams x 2 bufs x 4 MiB = 24 MiB, well under 48 MiB scoped / 64 phys.
    _BUDGET_2S, _BUDGET_3S, _VMEM_LIMIT = 4 << 20, 4 << 20, 48 << 20
elif "v6" in _KIND:
    _BUDGET_2S, _BUDGET_3S, _VMEM_LIMIT = 4 << 20, 2 << 20, 64 << 20
elif "v5" in _KIND:
    # Keep 2 MiB tiles but raise the scoped-VMEM limit explicitly (headroom
    # over the 16 MiB default for the 12 MiB three-stream footprint).
    _BUDGET_2S, _BUDGET_3S, _VMEM_LIMIT = 2 << 20, 2 << 20, 64 << 20
else:  # unknown chip: conservative, leave the compiler default limit alone
    _BUDGET_2S, _BUDGET_3S, _VMEM_LIMIT = 2 << 20, (3 << 20) // 2, None


def _cparams(n_axes: int) -> pltpu.CompilerParams:
    return pltpu.CompilerParams(
        dimension_semantics=("parallel",) * n_axes,
        vmem_limit_bytes=_VMEM_LIMIT,
    )


# ----------------------------------------------------------------------------
# Small helpers.
# ----------------------------------------------------------------------------
def _prod(xs):
    r = 1
    for d in xs:
        r *= d
    return r


def _round_up(v: int, m: int) -> int:
    return ((v + m - 1) // m) * m


def _round_down(v: int, m: int) -> int:
    return max(m, (v // m) * m)


def _sublane_mult(*dtypes) -> int:
    # dtype-native sublane packing: 8 rows/vreg for 32-bit, 16 for bf16, 32 for int8.
    isz = min(jnp.dtype(d).itemsize for d in dtypes)
    return max(8, 32 // max(1, isz))


def _as_2d(arr: jax.Array) -> jax.Array:
    """Free (layout-preserving) 2-D view of a contiguous array — no pad copies."""
    total = arr.size
    if total % _LANE == 0:
        return arr.reshape(total // _LANE, _LANE)
    if arr.ndim >= 2:
        return arr.reshape(_prod(arr.shape[:-1]), arr.shape[-1])
    return arr.reshape(1, total)


def _pick_cols_tile(cols: int, elems_budget: int, mult: int):
    """Lane-dim tile (tn) and its VMEM-padded width."""
    cols_pad = _round_up(cols, _LANE)
    if cols_pad * mult <= elems_budget:
        return cols, cols_pad  # full width in a single block
    tn = _round_down(elems_budget // mult, _LANE)
    tn = min(tn, _round_down(cols, _LANE))
    return tn, tn


def _pick_rows_tile(rows: int, cap_rows: int, mult: int) -> int:
    """Sublane-dim tile; on v7x keep >=2 grid steps so both TCs get work."""
    cap_rows = max(mult, _round_down(cap_rows, mult))
    if rows <= cap_rows:
        if _IS_V7 and rows > mult:
            return min(rows, _round_up(-(-rows // 2), mult))
        return rows
    return cap_rows


def _tile_2d(rows: int, cols: int, budget_bytes: int, itemsize: int, mult: int):
    elems = max(mult * _LANE, budget_bytes // itemsize)
    tn, tn_pad = _pick_cols_tile(cols, elems, mult)
    tm = _pick_rows_tile(rows, max(1, elems // tn_pad), mult)
    return tm, tn


# ----------------------------------------------------------------------------
# Kernels (pure VPU elementwise; y blocks broadcast in-register).
# ----------------------------------------------------------------------------
def _mul_kernel(x_ref, y_ref, o_ref):
    o_ref[...] = x_ref[...].astype(o_ref.dtype) * y_ref[...].astype(o_ref.dtype)


def _mul_scalar_smem_kernel(y_ref, x_ref, o_ref):
    # y_ref: (1,) float32 scalar in SMEM -> cheap sreg->vreg splat.
    o_ref[...] = (x_ref[...].astype(jnp.float32) * y_ref[0]).astype(o_ref.dtype)


# ----------------------------------------------------------------------------
# Dispatch paths.
# ----------------------------------------------------------------------------
def _scalar_y(x, y, out_shape, out_dtype):
    """Path A: y is a single element."""
    x2 = _as_2d(x)
    R, C = x2.shape
    mult = _sublane_mult(x.dtype, out_dtype)
    isz = max(jnp.dtype(x.dtype).itemsize, jnp.dtype(out_dtype).itemsize)
    tm, tn = _tile_2d(R, C, _BUDGET_2S, isz, mult)
    grid = (pl.cdiv(R, tm), pl.cdiv(C, tn))
    blk = pl.BlockSpec((tm, tn), lambda i, j: (i, j))

    if jnp.issubdtype(out_dtype, jnp.floating):
        out2 = pl.pallas_call(
            _mul_scalar_smem_kernel,
            out_shape=jax.ShapeDtypeStruct((R, C), out_dtype),
            grid_spec=pl.GridSpec(
                grid=grid,
                in_specs=[pl.BlockSpec(memory_space=pltpu.MemorySpace.SMEM), blk],
                out_specs=blk,
            ),
            compiler_params=_cparams(2),
        )(y.astype(jnp.float32).reshape(1), x2)
    else:
        # integer/bool scalar: resident (1,1) VMEM block instead.
        out2 = pl.pallas_call(
            _mul_kernel,
            out_shape=jax.ShapeDtypeStruct((R, C), out_dtype),
            grid_spec=pl.GridSpec(
                grid=grid,
                in_specs=[blk, pl.BlockSpec((1, 1), lambda i, j: (0, 0))],
                out_specs=blk,
            ),
            compiler_params=_cparams(2),
        )(x2, y.astype(out_dtype).reshape(1, 1))
    return out2.reshape(out_shape)


def _elementwise(x, y, out_shape, out_dtype):
    """Path C: both operands already have the full output size (no broadcast)."""
    x2, y2 = _as_2d(x), _as_2d(y)
    R, C = x2.shape
    mult = _sublane_mult(x.dtype, y.dtype, out_dtype)
    isz = max(jnp.dtype(x.dtype).itemsize, jnp.dtype(y.dtype).itemsize,
              jnp.dtype(out_dtype).itemsize)
    tm, tn = _tile_2d(R, C, _BUDGET_3S, isz, mult)
    blk = pl.BlockSpec((tm, tn), lambda i, j: (i, j))
    out2 = pl.pallas_call(
        _mul_kernel,
        out_shape=jax.ShapeDtypeStruct((R, C), out_dtype),
        grid_spec=pl.GridSpec(
            grid=(pl.cdiv(R, tm), pl.cdiv(C, tn)),
            in_specs=[blk, blk],
            out_specs=blk,
        ),
        compiler_params=_cparams(2),
    )(x2, y2)
    return out2.reshape(out_shape)


def _broadcast_y(x, y, outer, mid, inner, out_shape, out_dtype):
    """Path B: x is full-size; y varies only over one contiguous dim-run.

    Output viewed as (outer, mid[, inner]); y stays at its natural size
    (mid elements) and is replayed via index_map — never materialized.
    """
    mult = _sublane_mult(x.dtype, out_dtype)
    isz = max(jnp.dtype(x.dtype).itemsize, jnp.dtype(out_dtype).itemsize)
    elems = max(mult * _LANE, _BUDGET_2S // isz)

    if inner == 1:
        # y varies through the trailing output dims: 2-D (outer, mid),
        # y = (1, mid) column-stripe resident across the inner row loop.
        x2 = x.reshape(outer, mid)
        y2 = y.reshape(1, mid)
        tn, tn_pad = _pick_cols_tile(mid, elems, mult)
        tm = _pick_rows_tile(outer, max(1, elems // tn_pad), mult)
        # rows are the fastest grid axis -> the y block index is unchanged
        # across consecutive steps, so it is fetched once per column stripe.
        grid = (pl.cdiv(mid, tn), pl.cdiv(outer, tm))
        out2 = pl.pallas_call(
            _mul_kernel,
            out_shape=jax.ShapeDtypeStruct((outer, mid), out_dtype),
            grid_spec=pl.GridSpec(
                grid=grid,
                in_specs=[pl.BlockSpec((tm, tn), lambda j, i: (i, j)),
                          pl.BlockSpec((1, tn), lambda j, i: (0, j))],
                out_specs=pl.BlockSpec((tm, tn), lambda j, i: (i, j)),
            ),
            compiler_params=_cparams(2),
        )(x2, y2)
        return out2.reshape(out_shape)

    # inner > 1 (per-channel style, e.g. y = (1, C, 1, 1)): 3-D (outer, mid, inner),
    # y compacted to (1, mid, 1) and broadcast on the VPU inside the kernel.
    x3 = x.reshape(outer, mid, inner)
    y3 = y.reshape(1, mid, 1)
    inner_pad = _round_up(inner, _LANE)
    if inner_pad * mult > elems:
        tin = min(_round_down(elems // mult, _LANE), _round_down(inner, _LANE))
        tmid = min(mid, mult)
        tb = 1
    else:
        tin = inner
        mid_cap = max(1, elems // inner_pad)
        if mid > mid_cap:
            tmid = min(mid, max(mult, _round_down(mid_cap, mult)))
            tb = 1
        else:
            tmid = mid
            tb = min(outer, max(1, elems // (inner_pad * _round_up(mid, mult))))
            if _IS_V7 and tb >= outer and outer > 1:
                tb = -(-outer // 2)  # keep >=2 grid steps for the 2 TensorCores
    grid = (pl.cdiv(outer, tb), pl.cdiv(mid, tmid), pl.cdiv(inner, tin))
    out3 = pl.pallas_call(
        _mul_kernel,
        out_shape=jax.ShapeDtypeStruct((outer, mid, inner), out_dtype),
        grid_spec=pl.GridSpec(
            grid=grid,
            in_specs=[pl.BlockSpec((tb, tmid, tin), lambda b, c, j: (b, c, j)),
                      pl.BlockSpec((1, tmid, 1), lambda b, c, j: (0, c, 0))],
            out_specs=pl.BlockSpec((tb, tmid, tin), lambda b, c, j: (b, c, j)),
        ),
        compiler_params=_cparams(3),
    )(x3, y3)
    return out3.reshape(out_shape)


# ----------------------------------------------------------------------------
# Public wrapper (forward of the Mul module).
# ----------------------------------------------------------------------------
def pallas_mul(x, y) -> jax.Array:
    """Computes x * y with PyTorch/NumPy broadcasting via Pallas TPU kernels."""
    x = jnp.asarray(x)
    y = jnp.asarray(y)
    out_shape = jnp.broadcast_shapes(x.shape, y.shape)
    # Matches torch promotion for the float cases this module is used with.
    out_dtype = jnp.result_type(x.dtype, y.dtype)

    total = _prod(out_shape)
    if total == 0:
        return jnp.zeros(out_shape, out_dtype)

    rank = len(out_shape)
    ys = (1,) * (rank - y.ndim) + tuple(y.shape)
    xs = (1,) * (rank - x.ndim) + tuple(x.shape)
    x_full = xs == tuple(out_shape)
    y_full = ys == tuple(out_shape)

    # Path A: scalar y.
    if y.size == 1:
        return _scalar_y(x, y, out_shape, out_dtype)

    # Path C: pure elementwise (both operands already output-sized).
    if x_full and y_full:
        return _elementwise(x, y, out_shape, out_dtype)

    # Path B: x full-size, y broadcasts over a single contiguous run of dims.
    if x_full:
        nz = [d for d in range(rank) if ys[d] != 1]
        lo, hi = nz[0], nz[-1] + 1
        if all(ys[d] == out_shape[d] for d in range(lo, hi)):
            outer = _prod(out_shape[:lo])
            mid = _prod(out_shape[lo:hi])
            inner = _prod(out_shape[hi:])
            return _broadcast_y(x, y, outer, mid, inner, out_shape, out_dtype)

    # Path D: exotic broadcast (x broadcast / non-contiguous y pattern).
    # TODO(synk): replay these broadcast blocks via index_map too instead of
    # materializing; not hit by the Mul-module's usual shapes.
    xb = x if x_full else jnp.broadcast_to(x, out_shape)
    yb = y if y_full else jnp.broadcast_to(y, out_shape)
    return _elementwise(xb, yb, out_shape, out_dtype)


class Mul:
    """Mirror of the PyTorch module: holds the constant y from __init__."""

    def __init__(self, y):
        self.y = jnp.asarray(y)

    def __call__(self, x):
        return pallas_mul(x, self.y)


if __name__ == "__main__":
    key = jax.random.PRNGKey(0)
    kx, ky = jax.random.split(key)

    x = jax.random.normal(kx, (2, 4, 16, 16), dtype=jnp.float32)

    # Per-channel constant y (index_map-replayed broadcast path).
    y_ch = jax.random.normal(ky, (1, 4, 1, 1), dtype=jnp.float32)
    out = Mul(y_ch)(x)
    jax.block_until_ready(out)
    ref = x * y_ch
    assert out.shape == ref.shape and out.dtype == ref.dtype
    assert jnp.allclose(out, ref, atol=1e-6, rtol=1e-6)

    # Scalar y (SMEM splat path).
    y_s = jnp.float32(1.5)
    out_s = Mul(y_s)(x)
    jax.block_until_ready(out_s)
    assert jnp.allclose(out_s, x * y_s, atol=1e-6, rtol=1e-6)

    # Full-shape y (pure elementwise path).
    y_f = jax.random.normal(ky, (2, 4, 16, 16), dtype=jnp.float32)
    out_f = Mul(y_f)(x)
    jax.block_until_ready(out_f)
    assert jnp.allclose(out_f, x * y_f, atol=1e-6, rtol=1e-6)

    # Trailing-vector y (2-D broadcast path, y resident per column stripe).
    y_w = jax.random.normal(ky, (16,), dtype=jnp.float32)
    out_w = Mul(y_w)(x)
    jax.block_until_ready(out_w)
    assert jnp.allclose(out_w, x * y_w, atol=1e-6, rtol=1e-6)

    print("KERNEL_OK")
</pallas_src>

<mosaic_0001>
module attributes {stable_mosaic.version = 11 : i64} {
  func.func @_mul_kernel(%arg0: i32, %arg1: i32, %arg2: i32, %arg3: memref<2x4x256xf32, #tpu.memory_space<vmem>>, %arg4: memref<1x4x1xf32, #tpu.memory_space<vmem>>, %arg5: memref<2x4x256xf32, #tpu.memory_space<vmem>>) attributes {dimension_semantics = [#tpu.dimension_semantics<parallel>, #tpu.dimension_semantics<parallel>, #tpu.dimension_semantics<parallel>], iteration_bounds = array<i64: 1, 1, 1>, scalar_prefetch = 0 : i64, scratch_operands = 0 : i64, tpu.core_type = #tpu.core_type<tc>, window_params = [{transform_indices = @transform_0, window_bounds = array<i64: 2, 4, 256>}, {transform_indices = @transform_1, window_bounds = array<i64: 1, 4, 1>}, {transform_indices = @transform_2, window_bounds = array<i64: 2, 4, 256>}]} {
    %c0 = arith.constant 0 : index
    %c0_0 = arith.constant 0 : index
    %c0_1 = arith.constant 0 : index
    %0 = vector.load %arg3[%c0, %c0_0, %c0_1] : memref<2x4x256xf32, #tpu.memory_space<vmem>>, vector<2x4x256xf32>
    %c0_2 = arith.constant 0 : index
    %c0_3 = arith.constant 0 : index
    %c0_4 = arith.constant 0 : index
    %1 = vector.load %arg4[%c0_2, %c0_3, %c0_4] : memref<1x4x1xf32, #tpu.memory_space<vmem>>, vector<1x4x1xf32>
    %2 = vector.broadcast %1 : vector<1x4x1xf32> to vector<2x4x256xf32>
    %3 = arith.mulf %0, %2 : vector<2x4x256xf32>
    %c0_5 = arith.constant 0 : index
    %c0_6 = arith.constant 0 : index
    %c0_7 = arith.constant 0 : index
    %4 = vector.load %arg5[%c0_5, %c0_6, %c0_7] : memref<2x4x256xf32, #tpu.memory_space<vmem>>, vector<2x4x256xf32>
    tpu.vector_store %arg5[%c0_5, %c0_6, %c0_7], %3 {strides = array<i32>} : memref<2x4x256xf32, #tpu.memory_space<vmem>>, vector<2x4x256xf32>,
    return
  }
  func.func @transform_0(%arg0: i32, %arg1: i32, %arg2: i32) -> (i32, i32, i32) {
    %c0_i32 = arith.constant 0 : i32
    return %arg0, %arg1, %arg2 : i32, i32, i32
  }
  func.func @transform_1(%arg0: i32, %arg1: i32, %arg2: i32) -> (i32, i32, i32) {
    %c0_i32 = arith.constant 0 : i32
    %c0_i32_0 = arith.constant 0 : i32
    %c0_i32_1 = arith.constant 0 : i32
    return %c0_i32, %arg1, %c0_i32_0 : i32, i32, i32
  }
  func.func @transform_2(%arg0: i32, %arg1: i32, %arg2: i32) -> (i32, i32, i32) {
    %c0_i32 = arith.constant 0 : i32
    return %arg0, %arg1, %arg2 : i32, i32, i32
  }
}

</mosaic_0001>

<bundles_post_ra>
// kernel: tpu_custom_call.1
= control target key start
LH: loop header
LB: loop body
LE: loop exit
PB: predicated region body
PF: predicated region fallthrough
CT: control target
= control target key end

     0   :  { %7 = vsyncpa [#allocation3], 0  ;;  %s171_s0 = inlined_call_operand.hbm [shape: f32[2,4,256], index: 0, kind: input, shape index: {}]   ;;  %s172_s1 = inlined_call_operand.vmem [shape: f32[1,4,1], index: 1, kind: input, shape index: {}]   ;;  %s173_s2 = inlined_call_operand.hbm [shape: f32[2,4,256], index: 2, kind: output, shape index: {}]  }
   0x1   :  { %8 = vsyncpa [#allocation4], 0  ;;  %s117_s9 = smov [#allocation2]   ;;  %s69_s13 = scalar_lea.hbm %s171_s0, 256 }
   0x2   :  { %s14_s10 = sshll.u32 %s117_s9, 4  ;;  %p70_p0 = scmp.ne.s32.totalorder %s171_s0, %s69_s13  ;;  %s15_s10 = int_to_ptr.vmem [resolvable:$true] %s14_s10 }
   0x3   :  { %p73_p1 = scmp.lt.u32.totalorder %s69_s13, %s171_s0 }
   0x5   :  { %p75_p2 = pnand %p73_p1, %p70_p0 }
   0x7   :  { %78 = shalt.err (!%p75_p2)
}
   0x8   :  { %s79_s18 = scalar_lea.vmem %s15_s10, 256  ;;  %p84_p4 = scmp.lt.s32.totalorder %s15_s10, %s15_s10 }
   0x9   :  { %p80_p3 = scmp.ne.s32.totalorder %s15_s10, %s79_s18  ;;  %p85_p5 = scmp.lt.s32.totalorder %s79_s18, %s79_s18 }
   0xb   :  { %p86_p6 = por %p85_p5, %p84_p4 }
   0xd   :  { %p87_p7 = pnand %p86_p6, %p80_p3 }
   0xf   :  { %90 = shalt.err (!%p87_p7)
}
  0x10   :  { %s118_s19 = smov 128   ;;  %s119_s20 = smov 8  }
  0x11   :  { %20 = dma.hbm_to_vmem [thread:$0]  %s171_s0, 256, %s15_s10, [#allocation3], %s118_s19, %s118_s19, %s119_s20  }
  0x12   :  { %113 = dma.done.wait [#allocation3], 256  }
  0x13   :  { %114 = vsyncadd [#allocation3], 4294967040  ;;  %v120_v0 = vmov 0   ;;  %v28_v1 = vld [vmem:[%s172_s1] sm:$0xf]  ;;  %v36_v4 = vlaneseq  ;;  %v27_v10 = vld [vmem:[#allocation2 + $0x8] sm:$0xff] }
  0x14   :  { %68 = vset.pattern.permute.xlu0 %v120_v0  ;;  %v121_v2 = vmov 839922192   ;;  %v26_v9 = vld [vmem:[#allocation2] sm:$0xff]  ;;  %s122_s25 = smov [#allocation5]  }
  0x15   :  { %31 = vperm.xlu0 %68, %v28_v1   ;;  %v34_v3 = vunpack.c.l.s4 %v121_v2  ;;  %v37_v6 = vshrl.u32 %v36_v4, 7  ;;  %s50_s0 = sshll.u32 %s122_s25, 4  ;;  %s51_s0 = int_to_ptr.vmem [resolvable:$true] %s50_s0 }
  0x16   :  { %s91_s26 = scalar_lea.vmem %s51_s0, 256  ;;  %p96_p9 = scmp.lt.s32.totalorder %s51_s0, %s51_s0 }
  0x17   :  { %v35_v5 = vunpack.c.0.s8 %v34_v3  ;;  %p92_p8 = scmp.ne.s32.totalorder %s51_s0, %s91_s26  ;;  %p97_p10 = scmp.lt.s32.totalorder %s91_s26, %s91_s26 }
  0x19   :  { %v38_v7 = vsub.s32 %v35_v5, %v37_v6  ;;  %p98_p11 = por %p97_p10, %p96_p9 }
  0x1b   :  { %p99_p12 = pnand %p98_p11, %p92_p8 }
  0x94   :  { %v32_v8 = vpop.permute.xlu0 %31 }
  0x95   :  { %v39_v11 = vrot.slane %v32_v8, %v38_v7 }
  0x97   :  { %v41_v12 = vmul.f32 %v39_v11, %v26_v9  ;;  %v42_v13 = vmul.f32 %v39_v11, %v27_v10 }
  0x99   :  { %43 = vst [vmem:[#allocation5] sm:$0xff] %v41_v12  ;;  %44 = vst [vmem:[#allocation5 + $0x8] sm:$0xff] %v42_v13 }
  0x9a   :  { %102 = shalt.err (!%p99_p12)
}
  0x9b   :  { %s103_s28 = scalar_lea.hbm %s173_s2, 256 }
  0x9c   :  { %p104_p13 = scmp.ne.s32.totalorder %s173_s2, %s103_s28  ;;  %p107_p0 = scmp.lt.u32.totalorder %s103_s28, %s173_s2 }
  0x9e   :  { %p109_p1 = pnand %p107_p0, %p104_p13 }
  0xa0   :  { %112 = shalt.err (!%p109_p1)
}
  0xa1   :  { %56 = dma.vmem_to_hbm [thread:$0]  %s51_s0, 256, %s173_s2, [#allocation4], %s118_s19, %s118_s19, %s119_s20  }
  0xa2   :  { %115 = dma.done.wait [#allocation4], 256  }
  0xa3   :  { %116 = vsyncadd [#allocation4], 4294967040 }
  0xa4   :  { %60 = vsyncpa [#allocation3], 1 }
  0xa5   :  { %61 = vsyncpa [#allocation4], 1 }

</bundles_post_ra>
